<compile_context>
chip_gen: v7x
topology: tpu7x:2x2x1
jax: 0.10.0
libtpu: 0.0.40
codegen_flags: <defaults>
</compile_context>

<pallas_src>
import jax
import jax.numpy as jnp
from jax.experimental import pallas as pl
from jax.experimental.pallas import tpu as pltpu

_HID = 128                      # padded hidden width (fc_1: 80 -> 128, fc_2: 10 -> 128)
_V7X_VMEM = 64 * 1024 * 1024    # v7x per-TensorCore VMEM


def lr_kernel(x_ref, w1_ref, b1_ref, w2_ref, b2_ref, w3_ref, b3_ref, o_ref):
    cdt = w1_ref.dtype  # streaming/compute dtype (bf16 by default, f32 for strict parity)
    prec = (jax.lax.Precision.HIGHEST if cdt == jnp.float32
            else jax.lax.Precision.DEFAULT)

    # fc_1 + ReLU : (bm, dim) @ (dim, 128) on the MXU, f32 accumulate.
    h1 = jnp.dot(x_ref[...], w1_ref[...],
                 preferred_element_type=jnp.float32, precision=prec)
    h1 = jnp.maximum(h1 + b1_ref[...], 0.0)

    # TODO(synk): dropout (p=0.3) is a training-time op; identity at inference.

    # fc_2 + ReLU : (bm, 128) @ (128, 128).  Cast h1 to the compute dtype so the
    # MXU sees matched (bf16,bf16) operands; accumulation stays f32.
    h2 = jnp.dot(h1.astype(cdt), w2_ref[...],
                 preferred_element_type=jnp.float32, precision=prec)
    h2 = jnp.maximum(h2 + b2_ref[...], 0.0)

    # fc_3 (out_features == 1): VPU multiply + lane reduce against the (1, 128)
    # f32 weight row -- avoids a degenerate 1-column MXU matmul.
    o_ref[...] = (jnp.sum(h2 * w3_ref[...], axis=-1, keepdims=True)
                  + b3_ref[...])


def _round_up(n, m):
    return ((n + m - 1) // m) * m


def _cdiv(a, b):
    return -(-a // b)


def _tpu_vmem_capacity():
    try:
        return int(pltpu.get_tpu_info().vmem_capacity_bytes)
    except Exception:
        return _V7X_VMEM  # conservative (v7x-sized) fallback


def _default_bm(vmem_capacity):
    # v7x (64 MiB/TC VMEM): cap the tile at 8192 rows; v5e/v6e (128 MiB): 16384.
    return 8192 if vmem_capacity <= _V7X_VMEM else 16384


def _pick_tile(batch, bm, align):
    """Tile size: <= bm, multiple of `align`, and chosen so the grid has an
    (ideally even) count >= 2 whenever the batch is big enough — so the
    'parallel' grid axis has work for both TensorCores on megacore / v7x."""
    bm = max(align, _round_up(bm, align))
    if batch <= align:
        return align
    pairs = max(1, _cdiv(batch, 2 * bm))          # target an even step count
    bm_eff = _round_up(_cdiv(batch, 2 * pairs), align)
    return min(bm_eff, bm)


def _vmem_limit_bytes(bm, dim, dtype, vmem_capacity):
    xb = jnp.dtype(dtype).itemsize
    est = (2 * bm * dim * xb                      # double-buffered x tiles
           + 2 * bm * 4                           # double-buffered (bm, 1) out tiles
           + (dim * _HID + _HID * _HID) * xb      # resident W1 / W2
           + (3 * _HID + 1) * 4                   # resident biases + fc_3 row (f32)
           + bm * _HID * (4 + xb + 4 + 4))        # h1(f32), h1 cast, h2(f32), temps
    est += 2 * 1024 * 1024                        # Mosaic internal scratch headroom
    cap = (46 if vmem_capacity <= _V7X_VMEM else 96) * 1024 * 1024
    return int(max(16 * 1024 * 1024, min(est, cap)))


def pad_params(params, dtype=jnp.bfloat16):
    """Zero-pad the (80, 10, 1)-wide layers to lane-dense 128-wide operands.
    W1/W2 are stored in the streaming/compute dtype (bf16 default); biases and
    the fc_3 row stay f32 (they feed f32 VPU ops)."""
    w1, b1, w2, b2, w3, b3 = params
    dim = w1.shape[0]
    w1p = jnp.zeros((dim, _HID), jnp.float32).at[:, :80].set(w1).astype(dtype)
    b1p = jnp.zeros((1, _HID), jnp.float32).at[0, :80].set(b1)
    w2p = jnp.zeros((_HID, _HID), jnp.float32).at[:80, :10].set(w2).astype(dtype)
    b2p = jnp.zeros((1, _HID), jnp.float32).at[0, :10].set(b2)
    w3p = jnp.zeros((1, _HID), jnp.float32).at[0, :10].set(w3[:, 0])  # fc_3 as a row
    b3p = b3.reshape(1, 1).astype(jnp.float32)
    return (w1p, b1p, w2p, b2p, w3p, b3p)


def lr_forward(x, padded_params, *, bm=None):
    """x: (B, dim) float array.  Returns (B,) float32 (matches .squeeze(dim=1))."""
    w1, b1, w2, b2, w3, b3 = padded_params
    dtype = w1.dtype                       # streaming/compute dtype
    B, dim = x.shape
    x = x.astype(dtype)

    vmem_cap = _tpu_vmem_capacity()
    if bm is None:
        bm = _default_bm(vmem_cap)

    align = 16 if dtype == jnp.bfloat16 else 8   # bf16 sublane packing needs 16
    bm_eff = _pick_tile(B, bm, align)
    b_pad = _round_up(B, bm_eff)
    if b_pad != B:
        x = jnp.pad(x, ((0, b_pad - B), (0, 0)))  # padded rows sliced off below
    grid = b_pad // bm_eff

    out2d = pl.pallas_call(
        lr_kernel,
        out_shape=jax.ShapeDtypeStruct((b_pad, 1), jnp.float32),
        grid_spec=pl.GridSpec(
            grid=(grid,),
            in_specs=[
                pl.BlockSpec((bm_eff, dim), lambda i: (i, 0)),  # x tile (streamed)
                pl.BlockSpec((dim, _HID), lambda i: (0, 0)),    # W1 (VMEM-resident)
                pl.BlockSpec((1, _HID), lambda i: (0, 0)),      # b1
                pl.BlockSpec((_HID, _HID), lambda i: (0, 0)),   # W2 (VMEM-resident)
                pl.BlockSpec((1, _HID), lambda i: (0, 0)),      # b2
                pl.BlockSpec((1, _HID), lambda i: (0, 0)),      # W3 row (f32)
                pl.BlockSpec((1, 1), lambda i: (0, 0)),         # b3
            ],
            out_specs=pl.BlockSpec((bm_eff, 1), lambda i: (i, 0)),
        ),
        compiler_params=pltpu.CompilerParams(
            dimension_semantics=("parallel",),  # megacore / v7x dual-TC sharding
            vmem_limit_bytes=_vmem_limit_bytes(bm_eff, dim, dtype, vmem_cap),
        ),
    )(x, w1, b1, w2, b2, w3, b3)

    return out2d[:B, 0]  # glue: drop batch padding + .squeeze(dim=1)


def init_params(dim, key):
    """Deterministic init mirroring torch.nn.Linear's U(-1/sqrt(fan_in), +).
    Weights are stored pre-transposed as (in_features, out_features)."""
    def linear(k, fan_in, fan_out):
        kw, kb = jax.random.split(k)
        bound = 1.0 / jnp.sqrt(jnp.float32(fan_in))
        w = jax.random.uniform(kw, (fan_in, fan_out), jnp.float32, -bound, bound)
        b = jax.random.uniform(kb, (fan_out,), jnp.float32, -bound, bound)
        return w, b

    k1, k2, k3 = jax.random.split(key, 3)
    w1, b1 = linear(k1, dim, 80)
    w2, b2 = linear(k2, 80, 10)
    w3, b3 = linear(k3, 10, 1)
    return (w1, b1, w2, b2, w3, b3)


if __name__ == "__main__":
    key = jax.random.PRNGKey(0)
    k_x, k_p = jax.random.split(key)

    B, dim = 200, 32
    x = jax.random.normal(k_x, (B, dim), jnp.float32)
    params = init_params(dim, k_p)
    w1, b1, w2, b2, w3, b3 = params

    # Pure-JAX f32 reference (eval-mode dropout = identity).
    with jax.default_matmul_precision("highest"):
        h = jnp.maximum(x @ w1 + b1, 0.0)
        h = jnp.maximum(h @ w2 + b2, 0.0)
        y_ref_f32 = (h @ w3 + b3)[:, 0]

    # Pure-JAX bf16-streaming reference (same cast points as the default kernel).
    xb = x.astype(jnp.bfloat16)
    h1r = jnp.maximum(
        jnp.dot(xb, w1.astype(jnp.bfloat16), preferred_element_type=jnp.float32) + b1, 0.0)
    h2r = jnp.maximum(
        jnp.dot(h1r.astype(jnp.bfloat16), w2.astype(jnp.bfloat16),
                preferred_element_type=jnp.float32) + b2, 0.0)
    y_ref_bf16 = jnp.sum(h2r * w3[:, 0][None, :], axis=-1) + b3[0]

    # (a) default: bf16 streaming/compute, f32 accumulate; tile auto-picked so
    #     the grid has >= 2 steps (here B=200 -> 2 tiles of 112 with tail pad).
    p_bf16 = pad_params(params, jnp.bfloat16)
    y_bf = jax.block_until_ready(lr_forward(x, p_bf16))

    # (b) bf16 with a forced small tile -> multi-step grid (B=200 -> 4 x 64).
    y_bf_small = jax.block_until_ready(lr_forward(x, p_bf16, bm=64))

    # (c) strict-f32 path: f32 operands + precision=HIGHEST dots.
    p_f32 = pad_params(params, jnp.float32)
    y_f32 = jax.block_until_ready(lr_forward(x, p_f32))

    assert y_bf.shape == (B,) and y_bf_small.shape == (B,) and y_f32.shape == (B,)
    assert jnp.allclose(y_f32, y_ref_f32, atol=1e-4, rtol=1e-4), \
        float(jnp.max(jnp.abs(y_f32 - y_ref_f32)))
    assert jnp.allclose(y_bf, y_ref_bf16, atol=1e-3, rtol=1e-3), \
        float(jnp.max(jnp.abs(y_bf - y_ref_bf16)))
    assert jnp.allclose(y_bf_small, y_ref_bf16, atol=1e-3, rtol=1e-3), \
        float(jnp.max(jnp.abs(y_bf_small - y_ref_bf16)))
    # bf16 path also stays close to the full-f32 reference (sanity).
    assert jnp.allclose(y_bf, y_ref_f32, atol=6e-2, rtol=6e-2), \
        float(jnp.max(jnp.abs(y_bf - y_ref_f32)))
    print("KERNEL_OK")
</pallas_src>

<mosaic_0001>
module attributes {stable_mosaic.version = 11 : i64} {
  func.func @lr_kernel(%arg0: i32, %arg1: memref<112x32xbf16, #tpu.memory_space<vmem>>, %arg2: memref<32x128xbf16, #tpu.memory_space<vmem>>, %arg3: memref<1x128xf32, #tpu.memory_space<vmem>>, %arg4: memref<128x128xbf16, #tpu.memory_space<vmem>>, %arg5: memref<1x128xf32, #tpu.memory_space<vmem>>, %arg6: memref<1x128xf32, #tpu.memory_space<vmem>>, %arg7: memref<1x1xf32, #tpu.memory_space<vmem>>, %arg8: memref<112x1xf32, #tpu.memory_space<vmem>>) attributes {dimension_semantics = [#tpu.dimension_semantics<parallel>], iteration_bounds = array<i64: 2>, scalar_prefetch = 0 : i64, scratch_operands = 0 : i64, tpu.core_type = #tpu.core_type<tc>, window_params = [{transform_indices = @transform_0, window_bounds = array<i64: 112, 32>}, {pipeline_mode = #tpu.pipeline_mode<synchronous>, transform_indices = @transform_1, window_bounds = array<i64: 32, 128>}, {pipeline_mode = #tpu.pipeline_mode<synchronous>, transform_indices = @transform_2, window_bounds = array<i64: 1, 128>}, {pipeline_mode = #tpu.pipeline_mode<synchronous>, transform_indices = @transform_3, window_bounds = array<i64: 128, 128>}, {pipeline_mode = #tpu.pipeline_mode<synchronous>, transform_indices = @transform_4, window_bounds = array<i64: 1, 128>}, {pipeline_mode = #tpu.pipeline_mode<synchronous>, transform_indices = @transform_5, window_bounds = array<i64: 1, 128>}, {pipeline_mode = #tpu.pipeline_mode<synchronous>, transform_indices = @transform_6, window_bounds = array<i64: 1, 1>}, {transform_indices = @transform_7, window_bounds = array<i64: 112, 1>}]} {
    %c0 = arith.constant 0 : index
    %c0_0 = arith.constant 0 : index
    %0 = vector.load %arg1[%c0, %c0_0] : memref<112x32xbf16, #tpu.memory_space<vmem>>, vector<112x32xbf16>
    %c0_1 = arith.constant 0 : index
    %c0_2 = arith.constant 0 : index
    %1 = vector.load %arg2[%c0_1, %c0_2] : memref<32x128xbf16, #tpu.memory_space<vmem>>, vector<32x128xbf16>
    %cst = arith.constant dense<0.000000e+00> : vector<112x128xf32>
    %2 = tpu.matmul %0, %1, %cst {dimension_numbers = #tpu.dot_dimension_numbers<[1], [0], [0], [1], [0, 0, 1, 1], [], []>} : vector<112x32xbf16>, vector<32x128xbf16>, vector<112x128xf32> -> vector<112x128xf32>
    %c0_3 = arith.constant 0 : index
    %c0_4 = arith.constant 0 : index
    %3 = vector.load %arg3[%c0_3, %c0_4] : memref<1x128xf32, #tpu.memory_space<vmem>>, vector<1x128xf32>
    %4 = vector.broadcast %3 : vector<1x128xf32> to vector<112x128xf32>
    %5 = arith.addf %2, %4 : vector<112x128xf32>
    %cst_5 = arith.constant 0.000000e+00 : f32
    %6 = vector.broadcast %cst_5 : f32 to vector<112x128xf32>
    %7 = arith.maximumf %5, %6 : vector<112x128xf32>
    %8 = arith.truncf %7 : vector<112x128xf32> to vector<112x128xbf16>
    %c0_6 = arith.constant 0 : index
    %c0_7 = arith.constant 0 : index
    %9 = vector.load %arg4[%c0_6, %c0_7] : memref<128x128xbf16, #tpu.memory_space<vmem>>, vector<128x128xbf16>
    %cst_8 = arith.constant dense<0.000000e+00> : vector<112x128xf32>
    %10 = tpu.matmul %8, %9, %cst_8 {dimension_numbers = #tpu.dot_dimension_numbers<[1], [0], [0], [1], [0, 0, 1, 1], [], []>} : vector<112x128xbf16>, vector<128x128xbf16>, vector<112x128xf32> -> vector<112x128xf32>
    %c0_9 = arith.constant 0 : index
    %c0_10 = arith.constant 0 : index
    %11 = vector.load %arg5[%c0_9, %c0_10] : memref<1x128xf32, #tpu.memory_space<vmem>>, vector<1x128xf32>
    %12 = vector.broadcast %11 : vector<1x128xf32> to vector<112x128xf32>
    %13 = arith.addf %10, %12 : vector<112x128xf32>
    %cst_11 = arith.constant 0.000000e+00 : f32
    %14 = vector.broadcast %cst_11 : f32 to vector<112x128xf32>
    %15 = arith.maximumf %13, %14 : vector<112x128xf32>
    %c0_12 = arith.constant 0 : index
    %c0_13 = arith.constant 0 : index
    %16 = vector.load %arg6[%c0_12, %c0_13] : memref<1x128xf32, #tpu.memory_space<vmem>>, vector<1x128xf32>
    %17 = vector.broadcast %16 : vector<1x128xf32> to vector<112x128xf32>
    %18 = arith.mulf %15, %17 : vector<112x128xf32>
    %cst_14 = arith.constant dense<0.000000e+00> : vector<112xf32>
    %19 = vector.multi_reduction <add>, %18, %cst_14 [1] : vector<112x128xf32> to vector<112xf32>
    %20 = vector.shape_cast %19 : vector<112xf32> to vector<112x1xf32>
    %c0_15 = arith.constant 0 : index
    %c0_16 = arith.constant 0 : index
    %21 = vector.load %arg7[%c0_15, %c0_16] : memref<1x1xf32, #tpu.memory_space<vmem>>, vector<1x1xf32>
    %22 = vector.broadcast %21 : vector<1x1xf32> to vector<112x1xf32>
    %23 = arith.addf %20, %22 : vector<112x1xf32>
    %c0_17 = arith.constant 0 : index
    %c0_18 = arith.constant 0 : index
    %24 = vector.load %arg8[%c0_17, %c0_18] : memref<112x1xf32, #tpu.memory_space<vmem>>, vector<112x1xf32>
    tpu.vector_store %arg8[%c0_17, %c0_18], %23 {strides = array<i32>} : memref<112x1xf32, #tpu.memory_space<vmem>>, vector<112x1xf32>,
    return
  }
  func.func @transform_0(%arg0: i32) -> (i32, i32) {
    %c0_i32 = arith.constant 0 : i32
    %c0_i32_0 = arith.constant 0 : i32
    return %arg0, %c0_i32 : i32, i32
  }
  func.func @transform_1(%arg0: i32) -> (i32, i32) {
    %c0_i32 = arith.constant 0 : i32
    %c0_i32_0 = arith.constant 0 : i32
    %c0_i32_1 = arith.constant 0 : i32
    return %c0_i32, %c0_i32_0 : i32, i32
  }
  func.func @transform_2(%arg0: i32) -> (i32, i32) {
    %c0_i32 = arith.constant 0 : i32
    %c0_i32_0 = arith.constant 0 : i32
    %c0_i32_1 = arith.constant 0 : i32
    return %c0_i32, %c0_i32_0 : i32, i32
  }
  func.func @transform_3(%arg0: i32) -> (i32, i32) {
    %c0_i32 = arith.constant 0 : i32
    %c0_i32_0 = arith.constant 0 : i32
    %c0_i32_1 = arith.constant 0 : i32
    return %c0_i32, %c0_i32_0 : i32, i32
  }
  func.func @transform_4(%arg0: i32) -> (i32, i32) {
    %c0_i32 = arith.constant 0 : i32
    %c0_i32_0 = arith.constant 0 : i32
    %c0_i32_1 = arith.constant 0 : i32
    return %c0_i32, %c0_i32_0 : i32, i32
  }
  func.func @transform_5(%arg0: i32) -> (i32, i32) {
    %c0_i32 = arith.constant 0 : i32
    %c0_i32_0 = arith.constant 0 : i32
    %c0_i32_1 = arith.constant 0 : i32
    return %c0_i32, %c0_i32_0 : i32, i32
  }
  func.func @transform_6(%arg0: i32) -> (i32, i32) {
    %c0_i32 = arith.constant 0 : i32
    %c0_i32_0 = arith.constant 0 : i32
    %c0_i32_1 = arith.constant 0 : i32
    return %c0_i32, %c0_i32_0 : i32, i32
  }
  func.func @transform_7(%arg0: i32) -> (i32, i32) {
    %c0_i32 = arith.constant 0 : i32
    %c0_i32_0 = arith.constant 0 : i32
    return %arg0, %c0_i32 : i32, i32
  }
}

</mosaic_0001>

<bundles_post_ra>
// kernel: tpu_custom_call.1
= control target key start
LH: loop header
LB: loop body
LE: loop exit
PB: predicated region body
PF: predicated region fallthrough
CT: control target
= control target key end

     0   :  { %s1037_s26 = smov 0   ;;  %s1237_s0 = inlined_call_operand.vmem [shape: bf16[224,32], index: 0, kind: input, shape index: {}]   ;;  %s1238_s1 = inlined_call_operand.vmem [shape: bf16[32,128], index: 1, kind: input, shape index: {}]   ;;  %s1239_s2 = inlined_call_operand.vmem [shape: f32[1,128], index: 2, kind: input, shape index: {}]   ;;  %s1240_s3 = inlined_call_operand.vmem [shape: bf16[128,128], index: 3, kind: input, shape index: {}]   ;;  %s1241_s4 = inlined_call_operand.vmem [shape: f32[1,128], index: 4, kind: input, shape index: {}]   ;;  %s1242_s5 = inlined_call_operand.vmem [shape: f32[1,128], index: 5, kind: input, shape index: {}]   ;;  %s1243_s6 = inlined_call_operand.<no memory space> [shape: f32[1,1], index: 6, kind: input, shape index: {}]   ;;  %s1244_s7 = inlined_call_operand.vmem [shape: f32[224,1], index: 7, kind: output, shape index: {}]  }
   0x1   :  { %v12_v0 = vstv %s1243_s6 }
   0x2   :  { %13 = vst [vmem:[#allocation2] sm:$0x1] %v12_v0 }
   0x3 LB: > { %s804_s27 = sadd.s32 4294967295, %s990_s26   ;;  %p808_p0 = scmp.ge.s32.totalorder %s990_s26, 1  ;;  %s990_s26 = sphi %s1037_s26, %s19_s26  }
   0x4   : > { %p240_p1 = scmp.lt.s32.totalorder %s990_s26, 3 }
   0x6   : > { %p241_p2 = pnand %p808_p0, %p240_p1 }
   0x7   : > { %v967_v1 = vld [vmem:[%s1238_s1] sm:$0xff] (!%p241_p2)   ;;  %v992_v2 = vmov (!%p241_p2), 0.0   ;;  %v968_v3 = vld [vmem:[%s1238_s1 + $0x8] sm:$0xff] (!%p241_p2)   ;;  %vm993_vm0 = vmmov (!%p241_p2), 0   ;;  %s272_s8 = smul.u32 (!%p241_p2), 14, %s804_s27  ;;  %vm357_vm1 = vcmask (!%p241_p2), 261120  }
   0x8   : > { %244 = sbr.rel (%p241_p2) target bundleno = 652 (0x28c), region = 48  ;;  %865 = vmatprep.subr.bf16.mxu0 (!%p241_p2), %v992_v2  ;;  %941 = vmatprep.subr.bf16.mxu1 (!%p241_p2), %v992_v2  ;;  %v976_v4 = vld [vmem:[%s1240_s3] sm:$0xff] (!%p241_p2)   ;;  %v977_v5 = vld [vmem:[%s1240_s3 + $0x8] sm:$0xff] (!%p241_p2)   ;;  %v978_v7 = vld [vmem:[%s1240_s3 + $0x10] sm:$0xff] (!%p241_p2)   ;;  %vm733_vm2 = vcmask (!%p241_p2), 7168  }
   0x9   : > { %866 = vmatpush3.bf16.msra.mxu0 (!%p241_p2), %v967_v1  ;;  %869 = vmatprep.mubr.msk.bf16.mxu0 (!%p241_p2), %vm993_vm0, %v992_v2  ;;  %p273_p3 = scmp.lt.s32.totalorder (!%p241_p2), %s272_s8, 27  ;;  %v979_v8 = vld [vmem:[%s1240_s3 + $0x18] sm:$0xff] (!%p241_p2)   ;;  %v980_v10 = vld [vmem:[%s1240_s3 + $0x20] sm:$0xff] (!%p241_p2)   ;;  %v981_v12 = vld [vmem:[%s1240_s3 + $0x28] sm:$0xff] (!%p241_p2)  }
   0xa   : > { %867 = vmatprep.subr.bf16.mxu0 (!%p241_p2), %v992_v2  ;;  %917 = vmatprep.mubr.msk.bf16.mxu1 (!%p241_p2), %vm993_vm0, %v992_v2  ;;  %v982_v17 = vld [vmem:[%s1240_s3 + $0x30] sm:$0xff] (!%p241_p2)   ;;  %v983_v18 = vld [vmem:[%s1240_s3 + $0x38] sm:$0xff] (!%p241_p2)   ;;  %v1136_v19 = vld [vmem:[%s1239_s2] ss:$0 sm:$0xff] (!%p241_p2) }
   0xb   : > { %949 = vmatpush3.bf16.msra.mxu1 (!%p241_p2), %v976_v4 }
   0xc   : > { %942 = vmatprep.subr.bf16.mxu1 (!%p241_p2), %v992_v2 }
   0xd   : > { %868 = vmatpush3.bf16.msra.mxu0 (!%p241_p2), %v968_v3 }
   0xe   : > { %897 = vmatprep.subr.bf16.mxu0 (!%p241_p2), %v992_v2 }
   0xf   : > { %s1246_s8 = smov (!%p273_p3, %s272_s8), 27  ;;  %950 = vmatpush3.bf16.msra.mxu1 %v977_v5 }
  0x10   : > { %s809_s13 = sshll.u32 %s1246_s8, 2  ;;  %943 = vmatprep.subr.bf16.mxu1 %v992_v2 }
  0x11   : > { %s1072_s16 = scalar_lea.vmem %s1237_s0, %s809_s13  ;;  %s810_s13 = sshll.u32 %s1246_s8, 3 }
  0x12   : > { %v969_v6 = vld [vmem:[%s1072_s16] sm:$0xff]   ;;  %v970_v9 = vld [vmem:[%s1072_s16 + $0x8] sm:$0xff]   ;;  %v971_v11 = vld [vmem:[%s1072_s16 + $0x10] sm:$0xff]  }
  0x13   : > { %870 = vmatmul.mubr.msk.bf16.vlgmr.msra.gmra.mrb[0].mxu0 %vm357_vm1, %v969_v6  ;;  %951 = vmatpush3.bf16.msra.mxu1 %v978_v7  ;;  %v972_v13 = vld [vmem:[%s1072_s16 + $0x18] sm:$0xff]   ;;  %v973_v14 = vld [vmem:[%s1072_s16 + $0x20] sm:$0xff]   ;;  %v974_v15 = vld [vmem:[%s1072_s16 + $0x28] sm:$0xff]  }
  0x14   : > { %873 = vmatprep.mubr.msk.bf16.mxu0 %vm993_vm0, %v992_v2  ;;  %898 = vmatpush3.bf16.msra.mxu0 %v976_v4  ;;  %v975_v16 = vld [vmem:[%s1072_s16 + $0x30] sm:$0xff]   ;;  %s1204_s16 = scalar_lea.vmem %s1244_s7, %s810_s13 }
  0x15   : > { %899 = vmatprep.subr.bf16.mxu0 %v992_v2  ;;  %944 = vmatprep.subr.bf16.mxu1 %v992_v2 }
  0x17   : > { %952 = vmatpush3.bf16.msra.mxu1 %v979_v8 }
  0x18   : > { %900 = vmatpush3.bf16.msra.mxu0 %v977_v5  ;;  %945 = vmatprep.subr.bf16.mxu1 %v992_v2 }
  0x19   : > { %901 = vmatprep.subr.bf16.mxu0 %v992_v2 }
  0x1b   : > { %874 = vmatmul.mubr.msk.bf16.gmra.mrb[4].mxu0 %vm357_vm1, %v970_v9  ;;  %953 = vmatpush3.bf16.msra.mxu1 %v980_v10 }
  0x1c   : > { %877 = vmatprep.mubr.msk.bf16.mxu0 %vm993_vm0, %v992_v2  ;;  %902 = vmatpush3.bf16.msra.mxu0 %v978_v7 }
  0x1d   : > { %903 = vmatprep.subr.bf16.mxu0 %v992_v2  ;;  %946 = vmatprep.subr.bf16.mxu1 %v992_v2 }
  0x1f   : > { %954 = vmatpush3.bf16.msra.mxu1 %v981_v12 }
  0x20   : > { %904 = vmatpush3.bf16.msra.mxu0 %v979_v8  ;;  %947 = vmatprep.subr.bf16.mxu1 %v992_v2 }
  0x21   : > { %905 = vmatprep.subr.bf16.mxu0 %v992_v2 }
  0x23   : > { %878 = vmatmul.mubr.msk.bf16.gmra.mrb[8].mxu0 %vm357_vm1, %v971_v11  ;;  %955 = vmatpush3.bf16.msra.mxu1 %v982_v17 }
  0x24   : > { %881 = vmatprep.mubr.msk.bf16.mxu0 %vm993_vm0, %v992_v2  ;;  %906 = vmatpush3.bf16.msra.mxu0 %v980_v10 }
  0x25   : > { %907 = vmatprep.subr.bf16.mxu0 %v992_v2  ;;  %948 = vmatprep.subr.bf16.mxu1 %v992_v2 }
  0x27   : > { %956 = vmatpush3.bf16.msra.mxu1 %v983_v18 }
  0x28   : > { %908 = vmatpush3.bf16.msra.mxu0 %v981_v12 }
  0x29   : > { %909 = vmatprep.subr.bf16.mxu0 %v992_v2 }
  0x2b   : > { %882 = vmatmul.mubr.msk.bf16.gmra.mrb[12].mxu0 %vm357_vm1, %v972_v13 }
  0x2c   : > { %885 = vmatprep.mubr.msk.bf16.mxu0 %vm993_vm0, %v992_v2  ;;  %910 = vmatpush3.bf16.msra.mxu0 %v982_v17 }
  0x2d   : > { %911 = vmatprep.subr.bf16.mxu0 %v992_v2 }
  0x30   : > { %912 = vmatpush3.bf16.msra.mxu0 %v983_v18 }
  0x33   : > { %886 = vmatmul.mubr.msk.bf16.gmra.mrb[16].mxu0 %vm357_vm1, %v973_v14 }
  0x34   : > { %889 = vmatprep.mubr.msk.bf16.mxu0 %vm993_vm0, %v992_v2 }
  0x3b   : > { %890 = vmatmul.mubr.msk.bf16.gmra.mrb[20].mxu0 %vm357_vm1, %v974_v15 }
  0x3c   : > { %893 = vmatprep.mubr.msk.bf16.mxu0 %vm993_vm0, %v992_v2 }
  0x43   : > { %894 = vmatmul.mubr.msk.bf16.gmra.mrb[24].mxu0 %vm357_vm1, %v975_v16 }
  0x44   : > { %913 = vmatprep.mubr.msk.bf16.mxu0 %vm993_vm0, %v992_v2 }
  0xe6   : > { %v413_v20 = vpop.f32.mrb[0].mxu0 }
  0xe7   : > { %v414_v21 = vadd.f32 %v1136_v19, %v413_v20  ;;  %v871_v22 = vpop.f32.mrb[1].mxu0 }
  0xe8   : > { %v416_v23 = vpop.f32.mrb[2].mxu0 }
  0xe9   : > { %v417_v24 = vadd.f32 %v1136_v19, %v416_v23  ;;  %v872_v25 = vpop.f32.mrb[3].mxu0  ;;  %v468_v26 = vmax.f32 %v414_v21, 0.0  ;;  %v1165_v21 = vld [vmem:[%s1241_s4] ss:$0 sm:$0xff] }
  0xeb   : > { %v469_v27 = vmax.f32 %v417_v24, 0.0 }
  0xed   : > { %v482_v28 = vpack.c.bf16 %v469_v27, %v468_v26 }
  0xee   : > { %v421_v29 = vpop.f32.mrb[4].mxu0 }
  0xef   : > { %v422_v30 = vadd.f32 %v1136_v19, %v421_v29  ;;  %v875_v31 = vpop.f32.mrb[5].mxu0  ;;  %914 = vmatmul.mubr.bf16.vlgmr.msra.gmra.mrb[28].mxu0 %v482_v28 }
  0xf0   : > { %v424_v32 = vpop.f32.mrb[6].mxu0 }
  0xf1   : > { %v425_v33 = vadd.f32 %v1136_v19, %v424_v32  ;;  %v876_v34 = vpop.f32.mrb[7].mxu0  ;;  %v470_v35 = vmax.f32 %v422_v30, 0.0 }
  0xf3   : > { %v471_v36 = vmax.f32 %v425_v33, 0.0 }
  0xf5   : > { %v483_v37 = vpack.c.bf16 %v471_v36, %v470_v35 }
  0xf6   : > { %v429_v38 = vpop.f32.mrb[8].mxu0 }
  0xf7   : > { %v430_v39 = vadd.f32 %v1136_v19, %v429_v38  ;;  %v879_v40 = vpop.f32.mrb[9].mxu0  ;;  %918 = vmatmul.mubr.bf16.vlgmr.msra.gmra.mrb[0].mxu1 %v483_v37 }
  0xf8   : > { %v432_v41 = vpop.f32.mrb[10].mxu0  ;;  %921 = vmatprep.mubr.msk.bf16.mxu1 %vm993_vm0, %v992_v2 }
  0xf9   : > { %v433_v42 = vadd.f32 %v1136_v19, %v432_v41  ;;  %v880_v43 = vpop.f32.mrb[11].mxu0  ;;  %v472_v44 = vmax.f32 %v430_v39, 0.0 }
  0xfb   : > { %v473_v45 = vmax.f32 %v433_v42, 0.0 }
  0xfd   : > { %v484_v46 = vpack.c.bf16 %v473_v45, %v472_v44 }
  0xfe   : > { %v437_v47 = vpop.f32.mrb[12].mxu0 }
  0xff   : > { %v438_v48 = vadd.f32 %v1136_v19, %v437_v47  ;;  %v883_v49 = vpop.f32.mrb[13].mxu0  ;;  %922 = vmatmul.mubr.bf16.gmra.mrb[4].mxu1 %v484_v46 }
 0x100   : > { %v440_v50 = vpop.f32.mrb[14].mxu0  ;;  %925 = vmatprep.mubr.msk.bf16.mxu1 %vm993_vm0, %v992_v2 }
 0x101   : > { %v441_v51 = vadd.f32 %v1136_v19, %v440_v50  ;;  %v884_v52 = vpop.f32.mrb[15].mxu0  ;;  %v474_v53 = vmax.f32 %v438_v48, 0.0 }
 0x103   : > { %v475_v54 = vmax.f32 %v441_v51, 0.0 }
 0x105   : > { %v485_v55 = vpack.c.bf16 %v475_v54, %v474_v53 }
 0x106   : > { %v445_v56 = vpop.f32.mrb[16].mxu0 }
 0x107   : > { %v446_v57 = vadd.f32 %v1136_v19, %v445_v56  ;;  %v887_v58 = vpop.f32.mrb[17].mxu0  ;;  %926 = vmatmul.mubr.bf16.gmra.mrb[8].mxu1 %v485_v55 }
 0x108   : > { %v448_v59 = vpop.f32.mrb[18].mxu0  ;;  %929 = vmatprep.mubr.msk.bf16.mxu1 %vm993_vm0, %v992_v2 }
 0x109   : > { %v449_v60 = vadd.f32 %v1136_v19, %v448_v59  ;;  %v888_v61 = vpop.f32.mrb[19].mxu0  ;;  %v476_v62 = vmax.f32 %v446_v57, 0.0 }
 0x10b   : > { %v477_v63 = vmax.f32 %v449_v60, 0.0 }
 0x10d   : > { %v486_v0 = vpack.c.bf16 %v477_v63, %v476_v62 }
 0x10e   : > { %v453_v1 = vpop.f32.mrb[20].mxu0 }
 0x10f   : > { %v454_v3 = vadd.f32 %v1136_v19, %v453_v1  ;;  %v891_v4 = vpop.f32.mrb[21].mxu0  ;;  %930 = vmatmul.mubr.bf16.gmra.mrb[12].mxu1 %v486_v0 }
 0x110   : > { %v456_v5 = vpop.f32.mrb[22].mxu0  ;;  %933 = vmatprep.mubr.msk.bf16.mxu1 %vm993_vm0, %v992_v2 }
 0x111   : > { %v457_v6 = vadd.f32 %v1136_v19, %v456_v5  ;;  %v892_v7 = vpop.f32.mrb[23].mxu0  ;;  %v478_v8 = vmax.f32 %v454_v3, 0.0 }
 0x113   : > { %v479_v9 = vmax.f32 %v457_v6, 0.0 }
 0x115   : > { %v487_v10 = vpack.c.bf16 %v479_v9, %v478_v8 }
 0x116   : > { %v461_v11 = vpop.f32.mrb[24].mxu0 }
 0x117   : > { %v462_v12 = vadd.f32 %v1136_v19, %v461_v11  ;;  %v895_v13 = vpop.f32.mrb[25].mxu0  ;;  %934 = vmatmul.mubr.bf16.gmra.mrb[16].mxu1 %v487_v10 }
 0x118   : > { %v464_v14 = vpop.f32.mrb[26].mxu0  ;;  %937 = vmatprep.mubr.msk.bf16.mxu1 %vm993_vm0, %v992_v2  ;;  %v1171_v2 = vld [vmem:[%s1242_s5] ss:$0 sm:$0xff] }
 0x119   : > { %v465_v15 = vadd.f32 %v1136_v19, %v464_v14  ;;  %v896_v16 = vpop.f32.mrb[27].mxu0  ;;  %v480_v17 = vmax.f32 %v462_v12, 0.0 }
 0x11b   : > { %v481_v18 = vmax.f32 %v465_v15, 0.0 }
 0x11d   : > { %v488_v20 = vpack.c.bf16 %v481_v18, %v480_v17 }
 0x11f   : > { %938 = vmatmul.mubr.bf16.gmra.mrb[20].mxu1 %v488_v20 }
 0x1c2   : > { %v594_v22 = vpop.f32.mrb[28].mxu0 }
 0x1c3   : > { %v595_v23 = vadd.f32 %v1165_v21, %v594_v22  ;;  %v915_v24 = vpop.f32.mrb[29].mxu0 }
 0x1c4   : > { %v597_v25 = vpop.f32.mrb[30].mxu0 }
 0x1c5   : > { %v649_v19 = vmax.f32 %v595_v23, 0.0  ;;  %v598_v26 = vadd.f32 %v1165_v21, %v597_v25  ;;  %v916_v27 = vpop.f32.mrb[31].mxu0 }
 0x1c7   : > { %v650_v28 = vmax.f32 %v598_v26, 0.0  ;;  %v670_v29 = vmul.f32 %v1171_v2, %v649_v19 }
 0x1c9   : > { %684 = vadd.xlane.f32.xlu0 %v670_v29  ;;  %v671_v33 = vmul.f32 %v1171_v2, %v650_v28  ;;  %v838_v29 = vld [vmem:[#allocation2] ss:$0 sm:$0xff] }
 0x1ca   : > { %v602_v30 = vpop.f32.mrb[0].mxu1 }
 0x1cb   : > { %v603_v31 = vadd.f32 %v1165_v21, %v602_v30  ;;  %v919_v32 = vpop.f32.mrb[1].mxu1 }
 0x1cc   : > { %v605_v34 = vpop.f32.mrb[2].mxu1 }
 0x1cd   : > { %v651_v35 = vmax.f32 %v603_v31, 0.0  ;;  %v606_v36 = vadd.f32 %v1165_v21, %v605_v34  ;;  %v920_v37 = vpop.f32.mrb[3].mxu1  ;;  %686 = vadd.xlane.f32.xlu0 %v671_v33 }
 0x1cf   : > { %v652_v38 = vmax.f32 %v606_v36, 0.0  ;;  %v672_v39 = vmul.f32 %v1171_v2, %v651_v35 }
 0x1d1   : > { %688 = vadd.xlane.f32.xlu1 %v672_v39  ;;  %v673_v43 = vmul.f32 %v1171_v2, %v652_v38 }
 0x1d2   : > { %v610_v40 = vpop.f32.mrb[4].mxu1 }
 0x1d3   : > { %v611_v41 = vadd.f32 %v1165_v21, %v610_v40  ;;  %v923_v42 = vpop.f32.mrb[5].mxu1 }
 0x1d4   : > { %v613_v44 = vpop.f32.mrb[6].mxu1 }
 0x1d5   : > { %v653_v45 = vmax.f32 %v611_v41, 0.0  ;;  %v614_v46 = vadd.f32 %v1165_v21, %v613_v44  ;;  %690 = vadd.xlane.f32.xlu1 %v673_v43  ;;  %v924_v47 = vpop.f32.mrb[7].mxu1 }
 0x1d7   : > { %v654_v48 = vmax.f32 %v614_v46, 0.0  ;;  %v674_v49 = vmul.f32 %v1171_v2, %v653_v45 }
 0x1d9   : > { %692 = vadd.xlane.f32.xlu0 %v674_v49  ;;  %v675_v50 = vmul.f32 %v1171_v2, %v654_v48 }
 0x1da   : > { %v618_v51 = vpop.f32.mrb[8].mxu1 }
 0x1db   : > { %v619_v52 = vadd.f32 %v1165_v21, %v618_v51  ;;  %694 = vadd.xlane.f32.xlu1 %v675_v50  ;;  %v927_v53 = vpop.f32.mrb[9].mxu1 }
 0x1dc   : > { %v621_v54 = vpop.f32.mrb[10].mxu1 }
 0x1dd   : > { %v655_v55 = vmax.f32 %v619_v52, 0.0  ;;  %v622_v56 = vadd.f32 %v1165_v21, %v621_v54  ;;  %v928_v57 = vpop.f32.mrb[11].mxu1 }
 0x1df   : > { %v656_v58 = vmax.f32 %v622_v56, 0.0  ;;  %v676_v59 = vmul.f32 %v1171_v2, %v655_v55 }
 0x1e1   : > { %696 = vadd.xlane.f32.xlu0 %v676_v59  ;;  %v677_v60 = vmul.f32 %v1171_v2, %v656_v58 }
 0x1e2   : > { %v626_v61 = vpop.f32.mrb[12].mxu1 }
 0x1e3   : > { %v627_v62 = vadd.f32 %v1165_v21, %v626_v61  ;;  %698 = vadd.xlane.f32.xlu1 %v677_v60  ;;  %v931_v63 = vpop.f32.mrb[13].mxu1 }
 0x1e4   : > { %v629_v0 = vpop.f32.mrb[14].mxu1 }
 0x1e5   : > { %v657_v1 = vmax.f32 %v627_v62, 0.0  ;;  %v630_v3 = vadd.f32 %v1165_v21, %v629_v0  ;;  %v932_v4 = vpop.f32.mrb[15].mxu1 }
 0x1e7   : > { %v658_v5 = vmax.f32 %v630_v3, 0.0  ;;  %v678_v6 = vmul.f32 %v1171_v2, %v657_v1 }
 0x1e9   : > { %700 = vadd.xlane.f32.xlu0 %v678_v6  ;;  %v679_v7 = vmul.f32 %v1171_v2, %v658_v5 }
 0x1ea   : > { %v634_v8 = vpop.f32.mrb[16].mxu1 }
 0x1eb   : > { %v635_v9 = vadd.f32 %v1165_v21, %v634_v8  ;;  %702 = vadd.xlane.f32.xlu1 %v679_v7  ;;  %v935_v10 = vpop.f32.mrb[17].mxu1 }
 0x1ec   : > { %v637_v11 = vpop.f32.mrb[18].mxu1 }
 0x1ed   : > { %v659_v12 = vmax.f32 %v635_v9, 0.0  ;;  %v638_v13 = vadd.f32 %v1165_v21, %v637_v11  ;;  %v936_v14 = vpop.f32.mrb[19].mxu1 }
 0x1ef   : > { %v660_v15 = vmax.f32 %v638_v13, 0.0  ;;  %v680_v16 = vmul.f32 %v1171_v2, %v659_v12 }
 0x1f1   : > { %704 = vadd.xlane.f32.xlu0 %v680_v16  ;;  %v681_v17 = vmul.f32 %v1171_v2, %v660_v15 }
 0x1f2   : > { %v642_v18 = vpop.f32.mrb[20].mxu1 }
 0x1f3   : > { %v643_v20 = vadd.f32 %v1165_v21, %v642_v18  ;;  %706 = vadd.xlane.f32.xlu1 %v681_v17  ;;  %v939_v22 = vpop.f32.mrb[21].mxu1 }
 0x1f4   : > { %v645_v23 = vpop.f32.mrb[22].mxu1 }
 0x1f5   : > { %v661_v24 = vmax.f32 %v643_v20, 0.0  ;;  %v646_v25 = vadd.f32 %v1165_v21, %v645_v23  ;;  %v940_v19 = vpop.f32.mrb[23].mxu1 }
 0x1f7   : > { %v662_v26 = vmax.f32 %v646_v25, 0.0  ;;  %v682_v27 = vmul.f32 %v1171_v2, %v661_v24 }
 0x1f9   : > { %708 = vadd.xlane.f32.xlu0 %v682_v27  ;;  %v683_v28 = vmul.f32 %v1171_v2, %v662_v26 }
 0x1fb   : > { %710 = vadd.xlane.f32.xlu1 %v683_v28 }
 0x256   : > { %v685_v21 = vpop.xlane.xlu0 %684 }
 0x257   : > { %v719_v30 = vadd.f32 %v838_v29, %v685_v21 }
 0x259   : > { %734 = vst.msk [vmem:[%s1204_s16] sm:$0xff] %vm733_vm2, %v719_v30 }
 0x25a   : > { %v687_v2 = vpop.xlane.xlu0 %686 }
 0x25b   : > { %v720_v31 = vadd.f32 %v838_v29, %v687_v2 }
 0x25d   : > { %735 = vst.msk [vmem:[%s1204_s16 + $0x8] sm:$0xff] %vm733_vm2, %v720_v31 }
 0x25e   : > { %v689_v32 = vpop.xlane.xlu1 %688 }
 0x25f   : > { %v721_v33 = vadd.f32 %v838_v29, %v689_v32 }
 0x261   : > { %736 = vst.msk [vmem:[%s1204_s16 + $0x10] sm:$0xff] %vm733_vm2, %v721_v33 }
 0x262   : > { %v691_v34 = vpop.xlane.xlu1 %690 }
 0x263   : > { %v722_v35 = vadd.f32 %v838_v29, %v691_v34 }
 0x265   : > { %737 = vst.msk [vmem:[%s1204_s16 + $0x18] sm:$0xff] %vm733_vm2, %v722_v35 }
 0x266   : > { %v693_v36 = vpop.xlane.xlu0 %692 }
 0x267   : > { %v723_v37 = vadd.f32 %v838_v29, %v693_v36 }
 0x268   : > { %v695_v38 = vpop.xlane.xlu1 %694 }
 0x269   : > { %738 = vst.msk [vmem:[%s1204_s16 + $0x20] sm:$0xff] %vm733_vm2, %v723_v37  ;;  %v724_v39 = vadd.f32 %v838_v29, %v695_v38 }
 0x26b   : > { %739 = vst.msk [vmem:[%s1204_s16 + $0x28] sm:$0xff] %vm733_vm2, %v724_v39 }
 0x26e   : > { %v697_v40 = vpop.xlane.xlu0 %696 }
 0x26f   : > { %v725_v41 = vadd.f32 %v838_v29, %v697_v40 }
 0x270   : > { %v699_v42 = vpop.xlane.xlu1 %698 }
 0x271   : > { %740 = vst.msk [vmem:[%s1204_s16 + $0x30] sm:$0xff] %vm733_vm2, %v725_v41  ;;  %v726_v43 = vadd.f32 %v838_v29, %v699_v42 }
 0x273   : > { %741 = vst.msk [vmem:[%s1204_s16 + $0x38] sm:$0xff] %vm733_vm2, %v726_v43 }
 0x276   : > { %v701_v44 = vpop.xlane.xlu0 %700 }
 0x277   : > { %v727_v45 = vadd.f32 %v838_v29, %v701_v44 }
 0x278   : > { %v703_v46 = vpop.xlane.xlu1 %702 }
 0x279   : > { %742 = vst.msk [vmem:[%s1204_s16 + $0x40] sm:$0xff] %vm733_vm2, %v727_v45  ;;  %v728_v47 = vadd.f32 %v838_v29, %v703_v46 }
 0x27b   : > { %743 = vst.msk [vmem:[%s1204_s16 + $0x48] sm:$0xff] %vm733_vm2, %v728_v47 }
 0x27e   : > { %v705_v48 = vpop.xlane.xlu0 %704 }
 0x27f   : > { %v729_v49 = vadd.f32 %v838_v29, %v705_v48 }
 0x280   : > { %v707_v50 = vpop.xlane.xlu1 %706 }
 0x281   : > { %744 = vst.msk [vmem:[%s1204_s16 + $0x50] sm:$0xff] %vm733_vm2, %v729_v49  ;;  %v730_v51 = vadd.f32 %v838_v29, %v707_v50 }
 0x283   : > { %745 = vst.msk [vmem:[%s1204_s16 + $0x58] sm:$0xff] %vm733_vm2, %v730_v51 }
 0x286   : > { %v709_v52 = vpop.xlane.xlu0 %708 }
 0x287   : > { %v731_v53 = vadd.f32 %v838_v29, %v709_v52 }
 0x288   : > { %v711_v54 = vpop.xlane.xlu1 %710 }
 0x289   : > { %746 = vst.msk [vmem:[%s1204_s16 + $0x60] sm:$0xff] %vm733_vm2, %v731_v53  ;;  %v732_v55 = vadd.f32 %v838_v29, %v711_v54 }
 0x28b   : > { %747 = vst.msk [vmem:[%s1204_s16 + $0x68] sm:$0xff] %vm733_vm2, %v732_v55 }
 0x28c PF: > { %s19_s26 = sadd.s32 1, %s990_s26  }
 0x28d   : > { %p16_p4 = scmp.ge.s32.totalorder %s19_s26, 4  }
 0x28f   :  { %18 = sbr.rel (!%p16_p4) target bundleno = 3 (0x3), region = 78 }

</bundles_post_ra>
